<compile_context>
chip_gen: v5e
topology: v5e:2x2
jax: 0.10.0
libtpu: 0.0.40
codegen_flags: <defaults>
</compile_context>

<pallas_src>
import functools

import jax
import jax.numpy as jnp
from jax import lax
from jax.experimental import pallas as pl
from jax.experimental.pallas import tpu as pltpu

_SQRT_HALF = 0.7071067811865476  # 1/sqrt(2)


def _ff_kernel(x_ref, w1_ref, b1_ref, w2_ref, b2_ref, o_ref):
    # x_ref:  (tm, dim)        native dtype (f32 or bf16)
    # w1_ref: (dim, hidden)    b1_ref: (1, hidden)
    # w2_ref: (hidden, dim)    b2_ref: (1, dim)
    x = x_ref[...]  # keep the MXU on the native-dtype fast path (bf16 if given)

    # Linear 1: MXU matmul, f32 accumulate.
    h = jnp.dot(x, w1_ref[...], preferred_element_type=jnp.float32)
    h = h + b1_ref[...].astype(jnp.float32)

    # Exact GELU (PyTorch nn.GELU default: approximate='none'), in f32.
    # erf runs on the EUP (separate bundle slot from the VPU/MXU).
    h = 0.5 * h * (1.0 + lax.erf(h * jnp.float32(_SQRT_HALF)))

    # Dropout is identity at inference (dropout=0.0 / eval mode).
    # TODO(synk): training-mode dropout (pltpu.prng_random_bits mask) not implemented.

    # Linear 2: cast activations back to the weight dtype so bf16 weights keep
    # the MXU bf16 path; accumulate in f32.
    y = jnp.dot(h.astype(w2_ref.dtype), w2_ref[...],
                preferred_element_type=jnp.float32)
    y = y + b2_ref[...].astype(jnp.float32)

    o_ref[...] = y.astype(o_ref.dtype)


def _round_up(x, n):
    return ((x + n - 1) // n) * n


@functools.partial(jax.jit, static_argnames=("tm",))
def feed_forward(x, w1, b1, w2, b2, *, tm=256):
    """x: (batch, seq, dim) -> (batch, seq, dim)."""
    batch, seq, dim = x.shape
    hidden = w1.shape[1]
    m = batch * seq

    # Resident weight footprint (pipeline double-buffers -> 2x).
    w_bytes = (w1.size * w1.dtype.itemsize + w2.size * w2.dtype.itemsize
               + b1.size * b1.dtype.itemsize + b2.size * b2.dtype.itemsize)

    # Row tile: big enough to fill the MXU; shrink for tiny inputs; keep a
    # multiple of 8 (sublane granularity).  Auto-halve if f32 intermediates
    # plus double-buffered I/O tiles would exceed a conservative VMEM budget
    # (48 MiB keeps headroom on v7x's 64 MiB physical VMEM).
    tm_eff = min(tm, _round_up(m, 8))
    budget = 48 * 1024 * 1024

    def _vmem_needed(t):
        io = 2 * 2 * t * dim * x.dtype.itemsize            # x + out, double-buffered
        interm = (t * hidden + t * dim) * 4                 # f32 intermediates
        return 2 * w_bytes + io + 2 * interm

    while tm_eff > 8 and _vmem_needed(tm_eff) > budget:
        tm_eff = max(8, _round_up(tm_eff // 2, 8))

    m_pad = _round_up(m, tm_eff)

    x2d = x.reshape(m, dim)
    if m_pad != m:  # ragged M (e.g. 197-token ViT sequences): pad, slice later
        x2d = jnp.pad(x2d, ((0, m_pad - m), (0, 0)))

    b1_2d = b1.reshape(1, hidden)
    b2_2d = b2.reshape(1, dim)

    grid = (m_pad // tm_eff,)

    vmem_limit = int(min(max(_vmem_needed(tm_eff) + (4 << 20), 32 * 1024 * 1024),
                         64 * 1024 * 1024))

    cost = pl.CostEstimate(
        flops=4 * m_pad * dim * hidden,                     # two matmuls
        transcendentals=m_pad * hidden,                     # erf in GELU
        bytes_accessed=2 * m_pad * dim * x.dtype.itemsize + w_bytes,
    )

    out2d = pl.pallas_call(
        _ff_kernel,
        out_shape=jax.ShapeDtypeStruct((m_pad, dim), x.dtype),
        grid_spec=pltpu.PrefetchScalarGridSpec(
            num_scalar_prefetch=0,
            grid=grid,
            in_specs=[
                pl.BlockSpec((tm_eff, dim), lambda i: (i, 0)),   # x tile
                pl.BlockSpec((dim, hidden), lambda i: (0, 0)),   # W1 (resident)
                pl.BlockSpec((1, hidden), lambda i: (0, 0)),     # b1
                pl.BlockSpec((hidden, dim), lambda i: (0, 0)),   # W2 (resident)
                pl.BlockSpec((1, dim), lambda i: (0, 0)),        # b2
            ],
            out_specs=pl.BlockSpec((tm_eff, dim), lambda i: (i, 0)),
        ),
        compiler_params=pltpu.CompilerParams(
            dimension_semantics=("parallel",),   # megacore sharding
            vmem_limit_bytes=vmem_limit,
        ),
        cost_estimate=cost,
    )(x2d, w1, b1_2d, w2, b2_2d)

    if m_pad != m:
        out2d = out2d[:m]
    return out2d.reshape(batch, seq, dim)


def _reference(x, w1, b1, w2, b2):
    x32 = x.astype(jnp.float32)
    w1_32 = w1.astype(jnp.float32)
    w2_32 = w2.astype(jnp.float32)
    h = jnp.einsum("bsd,dh->bsh", x32, w1_32) + b1.astype(jnp.float32)
    h = 0.5 * h * (1.0 + lax.erf(h / jnp.sqrt(2.0)))
    return jnp.einsum("bsh,hd->bsd", h, w2_32) + b2.astype(jnp.float32)


if __name__ == "__main__":
    # Small shapes consistent with the module: (batch, seq, dim), hidden = 2*dim
    batch, seq, dim, hidden = 2, 8, 32, 64

    key = jax.random.PRNGKey(0)
    k_x, k_w1, k_b1, k_w2, k_b2 = jax.random.split(key, 5)

    x = jax.random.normal(k_x, (batch, seq, dim), dtype=jnp.float32)
    w1 = jax.random.normal(k_w1, (dim, hidden), dtype=jnp.float32) * 0.02
    b1 = jax.random.normal(k_b1, (hidden,), dtype=jnp.float32) * 0.02
    w2 = jax.random.normal(k_w2, (hidden, dim), dtype=jnp.float32) * 0.02
    b2 = jax.random.normal(k_b2, (dim,), dtype=jnp.float32) * 0.02

    ref = _reference(x, w1, b1, w2, b2)

    # f32 path
    out = jax.block_until_ready(feed_forward(x, w1, b1, w2, b2))
    assert out.shape == (batch, seq, dim)
    assert jnp.allclose(out, ref, atol=1e-5, rtol=1e-5), "f32 mismatch vs reference"

    # bf16 mixed-precision path (the production configuration on v6e/v7x)
    bf = jnp.bfloat16
    out_bf16 = jax.block_until_ready(
        feed_forward(x.astype(bf), w1.astype(bf), b1.astype(bf),
                     w2.astype(bf), b2.astype(bf)))
    assert out_bf16.shape == (batch, seq, dim)
    assert jnp.allclose(out_bf16.astype(jnp.float32), ref, atol=3e-2, rtol=3e-2), \
        "bf16 mismatch vs reference"

    # ragged-M path (e.g. 197-token ViT sequence) exercised via pad + slice
    x_r = jax.random.normal(k_x, (1, 197, dim), dtype=jnp.float32)
    out_r = jax.block_until_ready(feed_forward(x_r, w1, b1, w2, b2))
    ref_r = _reference(x_r, w1, b1, w2, b2)
    assert out_r.shape == (1, 197, dim)
    assert jnp.allclose(out_r, ref_r, atol=1e-5, rtol=1e-5), "ragged-M mismatch"

    print("KERNEL_OK")
</pallas_src>

<mosaic_0001>
module attributes {stable_mosaic.version = 11 : i64} {
  func.func @_ff_kernel(%arg0: i32, %arg1: memref<16x32xf32, #tpu.memory_space<vmem>>, %arg2: memref<32x64xf32, #tpu.memory_space<vmem>>, %arg3: memref<1x64xf32, #tpu.memory_space<vmem>>, %arg4: memref<64x32xf32, #tpu.memory_space<vmem>>, %arg5: memref<1x32xf32, #tpu.memory_space<vmem>>, %arg6: memref<16x32xf32, #tpu.memory_space<vmem>>) attributes {dimension_semantics = [#tpu.dimension_semantics<parallel>], iteration_bounds = array<i64: 1>, scalar_prefetch = 0 : i64, scratch_operands = 0 : i64, tpu.core_type = #tpu.core_type<tc>, window_params = [{transform_indices = @transform_0, window_bounds = array<i64: 16, 32>}, {pipeline_mode = #tpu.pipeline_mode<synchronous>, transform_indices = @transform_1, window_bounds = array<i64: 32, 64>}, {pipeline_mode = #tpu.pipeline_mode<synchronous>, transform_indices = @transform_2, window_bounds = array<i64: 1, 64>}, {pipeline_mode = #tpu.pipeline_mode<synchronous>, transform_indices = @transform_3, window_bounds = array<i64: 64, 32>}, {pipeline_mode = #tpu.pipeline_mode<synchronous>, transform_indices = @transform_4, window_bounds = array<i64: 1, 32>}, {transform_indices = @transform_5, window_bounds = array<i64: 16, 32>}]} {
    %c0 = arith.constant 0 : index
    %c0_0 = arith.constant 0 : index
    %0 = vector.load %arg1[%c0, %c0_0] : memref<16x32xf32, #tpu.memory_space<vmem>>, vector<16x32xf32>
    %c0_1 = arith.constant 0 : index
    %c0_2 = arith.constant 0 : index
    %1 = vector.load %arg2[%c0_1, %c0_2] : memref<32x64xf32, #tpu.memory_space<vmem>>, vector<32x64xf32>
    %cst = arith.constant dense<0.000000e+00> : vector<16x64xf32>
    %2 = tpu.matmul %0, %1, %cst {dimension_numbers = #tpu.dot_dimension_numbers<[1], [0], [0], [1], [0, 0, 1, 1], [], []>} : vector<16x32xf32>, vector<32x64xf32>, vector<16x64xf32> -> vector<16x64xf32>
    %c0_3 = arith.constant 0 : index
    %c0_4 = arith.constant 0 : index
    %3 = vector.load %arg3[%c0_3, %c0_4] : memref<1x64xf32, #tpu.memory_space<vmem>>, vector<1x64xf32>
    %4 = vector.broadcast %3 : vector<1x64xf32> to vector<16x64xf32>
    %5 = arith.addf %2, %4 : vector<16x64xf32>
    %cst_5 = arith.constant 5.000000e-01 : f32
    %6 = vector.broadcast %cst_5 : f32 to vector<16x64xf32>
    %7 = arith.mulf %6, %5 : vector<16x64xf32>
    %cst_6 = arith.constant 0.707106769 : f32
    %8 = vector.broadcast %cst_6 : f32 to vector<16x64xf32>
    %9 = arith.mulf %5, %8 : vector<16x64xf32>
    %10 = math.erf %9 : vector<16x64xf32>
    %cst_7 = arith.constant 1.000000e+00 : f32
    %11 = vector.broadcast %cst_7 : f32 to vector<16x64xf32>
    %12 = arith.addf %11, %10 : vector<16x64xf32>
    %13 = arith.mulf %7, %12 : vector<16x64xf32>
    %c0_8 = arith.constant 0 : index
    %c0_9 = arith.constant 0 : index
    %14 = vector.load %arg4[%c0_8, %c0_9] : memref<64x32xf32, #tpu.memory_space<vmem>>, vector<64x32xf32>
    %cst_10 = arith.constant dense<0.000000e+00> : vector<16x32xf32>
    %15 = tpu.matmul %13, %14, %cst_10 {dimension_numbers = #tpu.dot_dimension_numbers<[1], [0], [0], [1], [0, 0, 1, 1], [], []>} : vector<16x64xf32>, vector<64x32xf32>, vector<16x32xf32> -> vector<16x32xf32>
    %c0_11 = arith.constant 0 : index
    %c0_12 = arith.constant 0 : index
    %16 = vector.load %arg5[%c0_11, %c0_12] : memref<1x32xf32, #tpu.memory_space<vmem>>, vector<1x32xf32>
    %17 = vector.broadcast %16 : vector<1x32xf32> to vector<16x32xf32>
    %18 = arith.addf %15, %17 : vector<16x32xf32>
    %c0_13 = arith.constant 0 : index
    %c0_14 = arith.constant 0 : index
    %19 = vector.load %arg6[%c0_13, %c0_14] : memref<16x32xf32, #tpu.memory_space<vmem>>, vector<16x32xf32>
    tpu.vector_store %arg6[%c0_13, %c0_14], %18 {strides = array<i32>} : memref<16x32xf32, #tpu.memory_space<vmem>>, vector<16x32xf32>,
    return
  }
  func.func @transform_0(%arg0: i32) -> (i32, i32) {
    %c0_i32 = arith.constant 0 : i32
    %c0_i32_0 = arith.constant 0 : i32
    return %arg0, %c0_i32 : i32, i32
  }
  func.func @transform_1(%arg0: i32) -> (i32, i32) {
    %c0_i32 = arith.constant 0 : i32
    %c0_i32_0 = arith.constant 0 : i32
    %c0_i32_1 = arith.constant 0 : i32
    return %c0_i32, %c0_i32_0 : i32, i32
  }
  func.func @transform_2(%arg0: i32) -> (i32, i32) {
    %c0_i32 = arith.constant 0 : i32
    %c0_i32_0 = arith.constant 0 : i32
    %c0_i32_1 = arith.constant 0 : i32
    return %c0_i32, %c0_i32_0 : i32, i32
  }
  func.func @transform_3(%arg0: i32) -> (i32, i32) {
    %c0_i32 = arith.constant 0 : i32
    %c0_i32_0 = arith.constant 0 : i32
    %c0_i32_1 = arith.constant 0 : i32
    return %c0_i32, %c0_i32_0 : i32, i32
  }
  func.func @transform_4(%arg0: i32) -> (i32, i32) {
    %c0_i32 = arith.constant 0 : i32
    %c0_i32_0 = arith.constant 0 : i32
    %c0_i32_1 = arith.constant 0 : i32
    return %c0_i32, %c0_i32_0 : i32, i32
  }
  func.func @transform_5(%arg0: i32) -> (i32, i32) {
    %c0_i32 = arith.constant 0 : i32
    %c0_i32_0 = arith.constant 0 : i32
    return %arg0, %c0_i32 : i32, i32
  }
}

</mosaic_0001>

<bundles_post_ra>
// kernel: feed_forward.1
= control target key start
LH: loop header
LB: loop body
LE: loop exit
PB: predicated region body
PF: predicated region fallthrough
CT: control target
= control target key end

     0   :  { %s382_s0 = inlined_call_operand.vmem [shape: f32[16,32], index: 0, kind: input, shape index: {}]   ;;  %s383_s1 = inlined_call_operand.vmem [shape: f32[32,64], index: 1, kind: input, shape index: {}]   ;;  %s384_s2 = inlined_call_operand.vmem [shape: f32[1,64], index: 2, kind: input, shape index: {}]   ;;  %s385_s3 = inlined_call_operand.vmem [shape: f32[64,32], index: 3, kind: input, shape index: {}]   ;;  %s386_s4 = inlined_call_operand.vmem [shape: f32[1,32], index: 4, kind: input, shape index: {}]   ;;  %s387_s5 = inlined_call_operand.hbm [shape: f32[16,32], index: 5, kind: output, shape index: {}]  }
   0x1   :  { %v26_v0 = vld [vmem:[%s383_s1 + $0x18] sm:$0xff]  ;;  %v25_v1 = vld [vmem:[%s383_s1 + $0x10] sm:$0xff]  ;;  %v24_v2 = vld [vmem:[%s383_s1 + $0x8] sm:$0xff] }
   0x2   :  { %50 = vmatpush.msra.mxu0 %v26_v0  ;;  %217 = vmatpush.msra.mxu3 %v26_v0 }
   0x4   :  { %51 = vmatpush.msra.mxu0 %v25_v1  ;;  %218 = vmatpush.msra.mxu3 %v25_v1 }
   0x5   :  { %10 = vsyncpa [#allocation3], 0  ;;  %v23_v3 = vld [vmem:[%s383_s1] sm:$0xff]  ;;  %vm31_vm0 = vcmask 261120   ;;  %v22_v5 = vld [vmem:[%s382_s0 + $0x8] sm:$0xff]  ;;  %vm161_vm9 = vcmask 523264  }
   0x6   :  { %52 = vmatpush.msra.mxu0 %v24_v2  ;;  %219 = vmatpush.msra.mxu3 %v24_v2  ;;  %v21_v4 = vld [vmem:[%s382_s0] sm:$0xff]  ;;  %v156_v14 = vld [vmem:[%s385_s3 + $0x38] sm:$0xff]  ;;  %v155_v18 = vld [vmem:[%s385_s3 + $0x30] sm:$0xff]  ;;  %s264_s21 = smov [#allocation2]   ;;  %s199_s25 = sshll.u32 %s387_s5, 4  ;;  %s200_s25 = int_to_ptr.hbm [resolvable:$true] %s199_s25 }
   0x7   :  { %v232_v6 = vld [vmem:[%s384_s2] ss:$0 sm:$0xff]  ;;  %176 = vmatpush.msra.mxu1 %v156_v14  ;;  %221 = vmatpush.msra.mxu2 %v156_v14  ;;  %v154_v22 = vld [vmem:[%s385_s3 + $0x28] sm:$0xff]  ;;  %v152_v31 = vld [vmem:[%s385_s3 + $0x18] sm:$0xff]  ;;  %s197_s22 = sshll.u32 %s264_s21, 4  ;;  %s265_s26 = smov 128   ;;  %s198_s22 = int_to_ptr.vmem [resolvable:$true] %s197_s22 }
   0x8   :  { %53 = vmatpush.msra.mxu0 %v23_v3  ;;  %220 = vmatpush.msra.mxu3 %v23_v3  ;;  %v153_v26 = vld [vmem:[%s385_s3 + $0x20] sm:$0xff]  ;;  %v151_v35 = vld [vmem:[%s385_s3 + $0x10] sm:$0xff]  ;;  %v150_v40 = vld [vmem:[%s385_s3 + $0x8] sm:$0xff]  ;;  %s266_s27 = smov 8  }
   0x9   :  { %211 = vmatmul.msk.f32.vlgmr.msra.gmra.mxu0 %vm31_vm0, %v21_v4  ;;  %212 = vmatmul.msk.f32.vlgmr.msra.gmra.mxu3 %vm31_vm0, %v22_v5  ;;  %v149_v42 = vld [vmem:[%s385_s3] sm:$0xff] }
   0xa   :  { %177 = vmatpush.msra.mxu1 %v155_v18  ;;  %222 = vmatpush.msra.mxu2 %v155_v18 }
   0xc   :  { %178 = vmatpush.msra.mxu1 %v154_v22  ;;  %223 = vmatpush.msra.mxu2 %v154_v22 }
   0xe   :  { %179 = vmatpush.msra.mxu1 %v153_v26  ;;  %224 = vmatpush.msra.mxu2 %v153_v26 }
  0x10   :  { %180 = vmatpush.msra.mxu1 %v152_v31  ;;  %225 = vmatpush.msra.mxu2 %v152_v31 }
  0x12   :  { %181 = vmatpush.msra.mxu1 %v151_v35  ;;  %226 = vmatpush.msra.mxu2 %v151_v35 }
  0x14   :  { %182 = vmatpush.msra.mxu1 %v150_v40  ;;  %227 = vmatpush.msra.mxu2 %v150_v40 }
  0x16   :  { %183 = vmatpush.msra.mxu1 %v149_v42  ;;  %228 = vmatpush.msra.mxu2 %v149_v42 }
  0x86   :  { %v55_v7 = vpop.f32.mrf.mxu0 }
  0x87   :  { %v320_v8 = vadd.f32 %v232_v6, %v55_v7 }
  0x89   :  { %v323_v9 = vmul.f32 0.70710677, %v320_v8  ;;  %v61_v26 = vmul.f32 0.5, %v320_v8  ;;  %v233_v8 = vld [vmem:[%s386_s4] ss:$0 sm:$0xff] }
  0x8b   :  { %v65_v10 = vmul.f32 %v323_v9, %v323_v9 }
  0x8c   :  { %v58_v11 = vpop.f32.mrf.mxu3 }
  0x8d   :  { %v327_v12 = vmin.f32 %v65_v10, 16.0  ;;  %v329_v13 = vadd.f32 %v232_v6, %v58_v11 }
  0x8f   :  { %v67_v15 = vmul.f32 2.1237322e-06, %v327_v12  ;;  %v78_v16 = vmul.f32 3.8918573e-05, %v327_v12  ;;  %v337_v17 = vmul.f32 0.70710677, %v329_v13 }
  0x91   :  { %v68_v19 = vadd.f32 0.00028619796, %v67_v15  ;;  %v79_v20 = vadd.f32 0.001143296, %v78_v16  ;;  %v105_v21 = vmul.f32 %v337_v17, %v337_v17 }
  0x93   :  { %v69_v23 = vmul.f32 %v68_v19, %v327_v12  ;;  %v80_v24 = vmul.f32 %v79_v20, %v327_v12  ;;  %v106_v25 = vmin.f32 %v105_v21, 16.0 }
  0x95   :  { %v70_v27 = vadd.f32 0.0036580483, %v69_v23  ;;  %v81_v28 = vadd.f32 0.014752088, %v80_v24  ;;  %v107_v29 = vmul.f32 2.1237322e-06, %v106_v25 }
  0x96   :  { %v118_v30 = vmul.f32 3.8918573e-05, %v106_v25 }
  0x97   :  { %v82_v32 = vmul.f32 %v81_v28, %v327_v12  ;;  %v108_v33 = vadd.f32 0.00028619796, %v107_v29  ;;  %v71_v37 = vmul.f32 %v70_v27, %v327_v12 }
  0x98   :  { %v119_v34 = vadd.f32 0.001143296, %v118_v30 }
  0x99   :  { %v83_v36 = vadd.f32 0.112945676, %v82_v32  ;;  %v109_v38 = vmul.f32 %v108_v33, %v106_v25  ;;  %v72_v46 = vadd.f32 0.05243302, %v71_v37  ;;  %v62_v33 = vmul.f32 0.5, %v329_v13 }
  0x9a   :  { %v120_v39 = vmul.f32 %v119_v34, %v106_v25 }
  0x9b   :  { %v84_v41 = vmul.f32 %v83_v36, %v327_v12  ;;  %v110_v45 = vadd.f32 0.0036580483, %v109_v38  ;;  %v73_v52 = vmul.f32 %v72_v46, %v327_v12 }
  0x9c   :  { %v121_v43 = vadd.f32 0.014752088, %v120_v39 }
  0x9d   :  { %v85_v44 = vadd.f32 0.4994258, %v84_v41  ;;  %v111_v51 = vmul.f32 %v110_v45, %v106_v25  ;;  %v74_v56 = vadd.f32 0.18741608, %v73_v52 }
  0x9e   :  { %v122_v47 = vmul.f32 %v121_v43, %v106_v25 }
  0x9f   :  { %v86_v48 = vmul.f32 %v85_v44, %v327_v12  ;;  %v112_v55 = vadd.f32 0.05243302, %v111_v51  ;;  %v75_v61 = vmul.f32 %v74_v56, %v327_v12 }
  0xa0   :  { %v123_v49 = vadd.f32 0.112945676, %v122_v47 }
  0xa1   :  { %v87_v50 = vadd.f32 1.0, %v86_v48  ;;  %v113_v60 = vmul.f32 %v112_v55, %v106_v25  ;;  %v76_v2 = vadd.f32 1.1283791, %v75_v61 }
  0xa2   :  { %v124_v53 = vmul.f32 %v123_v49, %v106_v25 }
  0xa3   :  { %234 = vrcp.f32 %v87_v50  ;;  %v99_v0 = vand.u32 2147483648, %v87_v50  ;;  %v114_v1 = vadd.f32 0.18741608, %v113_v60  ;;  %v97_v4 = vand.u32 2147483647, %v87_v50 }
  0xa4   :  { %v125_v54 = vadd.f32 0.4994258, %v124_v53  ;;  %vm93_vm2 = vweird.f32 %v87_v50  ;;  %v77_v14 = vmul.f32 %v76_v2, %v323_v9 }
  0xa5   :  { %v100_v7 = vor.u32 1.1754944e-38, %v99_v0  ;;  %v115_v10 = vmul.f32 %v114_v1, %v106_v25  ;;  %vm98_vm4 = vcmp.eq.f32.partialorder %v97_v4, 8.507059e+37 }
  0xa6   :  { %v126_v57 = vmul.f32 %v125_v54, %v106_v25 }
  0xa7   :  { %v116_v20 = vadd.f32 1.1283791, %v115_v10 }
  0xa8   :  { %v127_v58 = vadd.f32 1.0, %v126_v57 }
  0xa9   :  { %v235_v59 = vpop.eup %234  ;;  %v117_v9 = vmul.f32 %v116_v20, %v337_v17 }
  0xaa   :  { %v89_v62 = vmul.f32 %v235_v59, %v87_v50  ;;  %236 = vrcp.f32 %v127_v58  ;;  %vm94_vm1 = vweird.f32 %v235_v59  ;;  %v139_v19 = vand.u32 2147483648, %v127_v58 }
  0xab   :  { %vm95_vm3 = vmor %vm93_vm2, %vm94_vm1  ;;  %v137_v22 = vand.u32 2147483647, %v127_v58  ;;  %vm133_vm6 = vweird.f32 %v127_v58 }
  0xac   :  { %v90_v63 = vsub.f32 1.0, %v89_v62  ;;  %v140_v25 = vor.u32 1.1754944e-38, %v139_v19 }
  0xad   :  { %vm138_vm8 = vcmp.eq.f32.partialorder %v137_v22, 8.507059e+37 }
  0xae   :  { %v91_v3 = vmul.f32 %v235_v59, %v90_v63 }
  0xb0   :  { %v237_v5 = vpop.eup %236  ;;  %v92_v6 = vadd.f32 %v235_v59, %v91_v3 }
  0xb1   :  { %v129_v11 = vmul.f32 %v237_v5, %v127_v58  ;;  %vm134_vm5 = vweird.f32 %v237_v5 }
  0xb2   :  { %v96_v15 = vsel %vm95_vm3, %v235_v59, %v92_v6  ;;  %vm135_vm7 = vmor %vm133_vm6, %vm134_vm5 }
  0xb3   :  { %v101_v12 = vsel %vm98_vm4, %v100_v7, %v96_v15  ;;  %v130_v16 = vsub.f32 1.0, %v129_v11 }
  0xb4   :  { %v102_v18 = vmul.f32 %v101_v12, %v77_v14 }
  0xb5   :  { %v131_v21 = vmul.f32 %v237_v5, %v130_v16 }
  0xb6   :  { %v213_v23 = vclamps-f32 %v102_v18, 1.0 }
  0xb7   :  { %v132_v24 = vadd.f32 %v237_v5, %v131_v21 }
  0xb8   :  { %v145_v27 = vadd.f32 1.0, %v213_v23 }
  0xb9   :  { %v136_v28 = vsel %vm135_vm7, %v237_v5, %v132_v24 }
  0xba   :  { %v141_v29 = vsel %vm138_vm8, %v140_v25, %v136_v28  ;;  %v147_v30 = vmul.f32 %v145_v27, %v61_v26 }
  0xbb   :  { %v142_v31 = vmul.f32 %v141_v29, %v117_v9 }
  0xbc   :  { %215 = vmatmul.msk.f32.vlgmr.msra.gmra.mxu1 %vm161_vm9, %v147_v30 }
  0xbd   :  { %v214_v32 = vclamps-f32 %v142_v31, 1.0 }
  0xbf   :  { %v146_v34 = vadd.f32 1.0, %v214_v32 }
  0xc1   :  { %v148_v35 = vmul.f32 %v146_v34, %v62_v33 }
  0xc3   :  { %216 = vmatmul.msk.f32.vlgmr.msra.gmra.mxu2 %vm161_vm9, %v148_v35 }
 0x139   :  { %v185_v36 = vpop.f32.mrf.mxu1 }
 0x13a   :  { %v186_v37 = vadd.f32 %v233_v8, %v185_v36 }
 0x13c   :  { %191 = vst.msk [vmem:[#allocation2] sm:$0xff] %vm31_vm0, %v186_v37 }
 0x146   :  { %v188_v17 = vpop.f32.mrf.mxu2 }
 0x147   :  { %v189_v13 = vadd.f32 %v233_v8, %v188_v17 }
 0x149   :  { %192 = vst.msk [vmem:[#allocation2 + $0x8] sm:$0xff] %vm31_vm0, %v189_v13 }
 0x14a   :  { %205 = dma.vmem_to_hbm [thread:$0]  %s198_s22, 256, %s200_s25, [#allocation3], %s265_s26, %s265_s26, %s266_s27  }
 0x14b   :  { %262 = dma.done.wait [#allocation3], 256  }
 0x14c   :  { %263 = vsyncadd [#allocation3], 4294967040 }
 0x14d   :  { %210 = vsyncpa [#allocation3], 1 }

</bundles_post_ra>
